<compile_context>
chip_gen: v6e
topology: v6e:2x2x1
jax: 0.10.0
libtpu: 0.0.40
codegen_flags: <defaults>
</compile_context>

<pallas_src>
from functools import partial

import jax
import jax.numpy as jnp
from jax.experimental import pallas as pl
from jax.experimental.pallas import tpu as pltpu

MINIMUM_STD = 0.001
LANES = 128        # every layer's output width is zero-padded to this
BIAS_ROWS = 8      # each bias gets its own sublane-aligned 8-row block
TILE_B = 512       # batch tile upper bound; sweep 512-1024 on real workloads


def _round_up(x, m):
    return -(-x // m) * m


# ---------------------------------------------------------------------------
# Host-side one-time packing: an MLP's weights + biases -> one VMEM slab
# ---------------------------------------------------------------------------
def _pack_layer(w, b, w_rows, lanes, dtype):
    """w: [in, out] (y = x @ w + b), b: [out]. Returns [w_rows + 8, lanes]."""
    in_dim, out_dim = w.shape
    blk = jnp.zeros((w_rows + BIAS_ROWS, lanes), dtype)
    blk = blk.at[:in_dim, :out_dim].set(w.astype(dtype))
    blk = blk.at[w_rows, :out_dim].set(jnp.reshape(b, (-1,)).astype(dtype))
    return blk


def pack_ensemble_params(enc_params, trans_params_list, *, lanes=LANES,
                         dtype=jnp.bfloat16):
    """Pack encoder -> [3*region, lanes]; whole ensemble -> [E, 3*region, lanes].

    Each per-layer region (region = w_rows + 8 rows):
        rows [0, in_dim) : weight (zero padded to w_rows x lanes)
        row  w_rows      : bias   (zero padded to lanes)
    Zero padding is exact through Linear/ReLU chains (extra units stay 0).

    dtype=jnp.bfloat16 (default) halves slab bytes and is MXU-native on
    v6e/v7x; accumulation and the elementwise tail stay f32 in-kernel.
    dtype=jnp.float32 gives exact parity with the f32 PyTorch reference.

    Returns (enc_slab, trans_slab, dims) with
        dims = (in_dim, enc_hidden, enc_out, trans_hidden, out_size)
    as static Python ints for the kernel's K-trimming.
    """
    ew1, eb1, ew2, eb2, ew3, eb3 = enc_params
    in_dim = int(ew1.shape[0])
    enc_hidden = int(ew1.shape[1])
    enc_out = int(ew3.shape[1])
    trans_hidden = int(trans_params_list[0][0].shape[1])
    out_size = int(trans_params_list[0][4].shape[1]) // 2

    all_in = [ew1.shape[0], ew2.shape[0], ew3.shape[0]]
    for (t1, c1, t2, c2, t3, c3) in trans_params_list:
        all_in += [t1.shape[0], t2.shape[0], t3.shape[0]]
        for w in (t1, t2, t3):
            assert w.shape[1] <= lanes, "layer output width must be <= 128"
        assert t3.shape[1] == 2 * out_size
    for w in (ew1, ew2, ew3):
        assert w.shape[1] <= lanes, "layer output width must be <= 128"
    assert 2 * out_size <= lanes

    # Slab rows per layer: just enough for the largest fan-in (multiple of 8).
    w_rows = _round_up(int(max(all_in)), 8)

    enc_slab = jnp.concatenate(
        [_pack_layer(ew1, eb1, w_rows, lanes, dtype),
         _pack_layer(ew2, eb2, w_rows, lanes, dtype),
         _pack_layer(ew3, eb3, w_rows, lanes, dtype)], axis=0)

    members = []
    for (t1, c1, t2, c2, t3, c3) in trans_params_list:
        # PyTorch reshape(-1, out, 2): mu = even cols, logvar = odd cols.
        # Reorder ONCE on the host so mu -> cols [0,out), logvar -> [out,2*out);
        # the kernel then needs a single fused matmul for the head.
        c3 = jnp.reshape(c3, (-1,))
        t3r = jnp.concatenate([t3[:, 0::2], t3[:, 1::2]], axis=1)
        c3r = jnp.concatenate([c3[0::2], c3[1::2]], axis=0)
        members.append(jnp.concatenate(
            [_pack_layer(t1, c1, w_rows, lanes, dtype),
             _pack_layer(t2, c2, w_rows, lanes, dtype),
             _pack_layer(t3r, c3r, w_rows, lanes, dtype)], axis=0))
    trans_slab = jnp.stack(members, axis=0)

    dims = (in_dim, enc_hidden, enc_out, trans_hidden, out_size)
    return enc_slab, trans_slab, dims


# ---------------------------------------------------------------------------
# Kernel
# ---------------------------------------------------------------------------
def _make_kernel(*, region, w_rows, k_dims, out_size):
    k_e1, k_e2, k_e3, k_t1, k_t2, k_t3 = k_dims

    def _layer(h, slab_ref, layer_idx, k, relu):
        base = layer_idx * region                       # multiple of 8
        w = slab_ref[base:base + k, :]                  # static, 8-aligned
        b = slab_ref[base + w_rows:base + w_rows + 1, :]
        # Trimmed contraction (only the real fan-in rows), bf16 MXU inputs,
        # f32 accumulation; ReLU and everything downstream stays f32.
        y = jnp.dot(h[:, :k].astype(w.dtype), w,
                    preferred_element_type=jnp.float32)
        y = y + b.astype(jnp.float32)
        return jnp.maximum(y, 0.0) if relu else y

    def kernel(idx_ref, xe_ref, enc_ref, trans_ref, out_ref):
        del idx_ref  # consumed by the trans_slab index_map (scalar prefetch)
        t_ref = trans_ref.at[0]          # view of the selected member's slab

        xe = xe_ref[...]                 # merged [tb, in_rows + out_size] f32
        x = xe[:, :k_e1]
        eps = xe[:, k_e1:k_e1 + out_size]

        # BigEncoder: Linear -> ReLU -> Linear -> ReLU -> Linear
        h = _layer(x, enc_ref, 0, k_e1, True)
        h = _layer(h, enc_ref, 1, k_e2, True)
        latent = _layer(h, enc_ref, 2, k_e3, False)

        # StochasticTransitionModel MLP, fused mu/logvar head
        t = _layer(latent, t_ref, 0, k_t1, True)
        t = _layer(t, t_ref, 1, k_t2, True)
        z = _layer(t, t_ref, 2, k_t3, False)            # [tb, mu|logvar|0...]

        mu = z[:, :out_size]
        logvar = z[:, out_size:2 * out_size]
        # Matches the PyTorch module exactly: std = exp(logvar) + minimum_std.
        # Padded batch rows only see bias-driven logvar -> finite, then sliced
        # off by the wrapper (benign).
        std = jnp.exp(logvar) + MINIMUM_STD
        out_ref[...] = eps * std + mu

    return kernel


# ---------------------------------------------------------------------------
# Wrapper
# ---------------------------------------------------------------------------
@partial(jax.jit, static_argnames=("dims",))
def ensemble_forward_pallas(model_idx, state_action, epsilon, enc_slab,
                            trans_slab, *, dims):
    """Fused encoder + (scalar-prefetch-selected) stochastic transition model.

    model_idx    int32 [1]        ensemble member to use (runtime value)
    state_action f32 [B, in]      torch.cat((state, action), dim=1)
    epsilon      f32 [B, out]     standard normal noise
    enc_slab     [3*region, L]    from pack_ensemble_params
    trans_slab   [E, 3*region, L]
    dims         static tuple     (in, enc_hidden, enc_out, trans_hidden, out)
    """
    in_dim, enc_hidden, enc_out, trans_hidden, out_size = dims
    f32 = jnp.float32
    x = state_action.astype(f32)
    eps = epsilon.astype(f32)
    batch = x.shape[0]
    assert x.shape[1] == in_dim and eps.shape[1] == out_size

    lanes = enc_slab.shape[1]
    region = enc_slab.shape[0] // 3
    w_rows = region - BIAS_ROWS
    n_members = trans_slab.shape[0]
    assert 2 * out_size <= lanes

    # Per-layer contraction widths (static, multiples of 8).
    in_rows = _round_up(in_dim, 8)
    k_dims = (in_rows,
              _round_up(enc_hidden, 8), _round_up(enc_hidden, 8),
              _round_up(enc_out, 8),
              _round_up(trans_hidden, 8), _round_up(trans_hidden, 8))

    # One merged streamed input [x | eps]: a single narrow lane tile per block
    # instead of two (halves streamed VMEM + DMA descriptors per grid step).
    if in_rows != in_dim:
        x = jnp.pad(x, ((0, 0), (0, in_rows - in_dim)))
    xe = jnp.concatenate([x, eps], axis=1)             # [B, in_rows + out]
    xe_cols = in_rows + out_size

    # Batch tiling: always tile + cdiv (no whole-batch fallback); >=2 grid
    # steps for B >= 16 so v7x's second TensorCore gets engaged.
    tb = min(TILE_B, _round_up(max(pl.cdiv(batch, 2), 8), 8))
    b_pad = _round_up(batch, tb)
    if b_pad != batch:
        xe = jnp.pad(xe, ((0, b_pad - batch), (0, 0)))  # zero pad is benign
    grid = (pl.cdiv(b_pad, tb),)

    kernel = _make_kernel(region=region, w_rows=w_rows, k_dims=k_dims,
                          out_size=out_size)

    # Runtime member selection, clamped so an OOB index can never DMA past
    # the ensemble slab.
    idx = jnp.clip(jnp.asarray(model_idx, jnp.int32).reshape((1,)),
                   0, n_members - 1)

    itemsize = jnp.dtype(enc_slab.dtype).itemsize
    cost = pl.CostEstimate(
        flops=2 * b_pad * sum(k_dims) * lanes,
        transcendentals=b_pad * out_size,
        bytes_accessed=(xe.size * 4 + b_pad * out_size * 4
                        + enc_slab.size * itemsize
                        + (trans_slab.size // n_members) * itemsize),
    )

    out = pl.pallas_call(
        kernel,
        out_shape=jax.ShapeDtypeStruct((b_pad, out_size), f32),
        grid_spec=pltpu.PrefetchScalarGridSpec(
            num_scalar_prefetch=1,
            grid=grid,
            in_specs=[
                # merged [x|eps] stream, tiled over batch
                pl.BlockSpec((tb, xe_cols), lambda b, i: (b, 0)),
                # encoder slab: constant index_map -> stays VMEM resident
                pl.BlockSpec(enc_slab.shape, lambda b, i: (0, 0)),
                # only the selected member's slab is DMA'd (scalar prefetch)
                pl.BlockSpec((1,) + trans_slab.shape[1:],
                             lambda b, i: (i[0], 0, 0)),
            ],
            out_specs=pl.BlockSpec((tb, out_size), lambda b, i: (b, 0)),
        ),
        compiler_params=pltpu.CompilerParams(
            dimension_semantics=("parallel",)),
        cost_estimate=cost,
    )(idx, xe, enc_slab, trans_slab)

    return out[:batch]


# ---------------------------------------------------------------------------
# Pure-JAX reference (f32 port of the PyTorch forward) + demo
# ---------------------------------------------------------------------------
def reference_forward(state_action, enc_params, trans_params, epsilon):
    ew1, eb1, ew2, eb2, ew3, eb3 = enc_params
    t1, c1, t2, c2, t3, c3 = trans_params
    relu = lambda v: jnp.maximum(v, 0.0)
    h = relu(state_action @ ew1 + eb1)
    h = relu(h @ ew2 + eb2)
    latent = h @ ew3 + eb3
    u = relu(latent @ t1 + c1)
    u = relu(u @ t2 + c2)
    z = (u @ t3 + c3).reshape(state_action.shape[0], -1, 2)
    mu, logvar = z[:, :, 0], z[:, :, 1]
    std = jnp.exp(logvar) + MINIMUM_STD
    return epsilon * std + mu


def _init_linear(key, in_features, out_features):
    """PyTorch-Linear-like init; weight stored as [in, out] (y = x @ W + b)."""
    kw, kb = jax.random.split(key)
    bound = 1.0 / (in_features ** 0.5)
    w = jax.random.uniform(kw, (in_features, out_features), jnp.float32, -bound, bound)
    b = jax.random.uniform(kb, (out_features,), jnp.float32, -bound, bound)
    return w, b


if __name__ == "__main__":
    batch = 20                       # exercises batch padding + >=2 grid steps
    state_dim, action_dim = 12, 4
    input_size = state_dim + action_dim               # 16
    encoder_hidden_size = 32
    encoder_output_size = 32       # must equal transition input (module constraint)
    transition_model_hidden_size = 32
    transition_model_output_size = 16                 # next_state + reward
    ensemble_size = 3

    root = jax.random.PRNGKey(0)
    k_enc, k_models, k_state, k_action, k_eps, k_choice = jax.random.split(root, 6)

    # ---- BigEncoder params ----
    ke1, ke2, ke3 = jax.random.split(k_enc, 3)
    ew1, eb1 = _init_linear(ke1, input_size, encoder_hidden_size)
    ew2, eb2 = _init_linear(ke2, encoder_hidden_size, encoder_hidden_size)
    ew3, eb3 = _init_linear(ke3, encoder_hidden_size, encoder_output_size)
    enc_params = (ew1, eb1, ew2, eb2, ew3, eb3)

    # ---- Ensemble of StochasticTransitionModel params ----
    trans_params_list = []
    for mk in jax.random.split(k_models, ensemble_size):
        kt1, kt2, kt3 = jax.random.split(mk, 3)
        t1, c1 = _init_linear(kt1, encoder_hidden_size, transition_model_hidden_size)
        t2, c2 = _init_linear(kt2, transition_model_hidden_size, transition_model_hidden_size)
        t3, c3 = _init_linear(kt3, transition_model_hidden_size,
                              2 * transition_model_output_size)
        trans_params_list.append((t1, c1, t2, c2, t3, c3))

    # One-time packing of all parameters into two VMEM-friendly slabs.
    # bf16 slabs (v6e/v7x MXU-native); pass dtype=jnp.float32 for exact parity.
    enc_slab, trans_slab, dims = pack_ensemble_params(
        enc_params, trans_params_list, dtype=jnp.bfloat16)

    # ---- Inputs ----
    state = jax.random.normal(k_state, (batch, state_dim), jnp.float32)
    action = jax.random.normal(k_action, (batch, action_dim), jnp.float32)
    state_action = jnp.concatenate([state, action], axis=1)   # torch.cat(dim=1)
    epsilon = jax.random.normal(                              # torch.randn((B, out))
        k_eps, (batch, transition_model_output_size), jnp.float32)

    # random.choice over the ensemble, but as a runtime value: one compiled
    # kernel serves any member (selection works inside jitted rollouts too).
    model_idx = jax.random.randint(k_choice, (1,), 0, ensemble_size, dtype=jnp.int32)

    out = ensemble_forward_pallas(model_idx, state_action, epsilon,
                                  enc_slab, trans_slab, dims=dims)
    out = jax.block_until_ready(out)

    ref = reference_forward(state_action, enc_params,
                            trans_params_list[int(model_idx[0])], epsilon)

    assert out.shape == (batch, transition_model_output_size)
    assert bool(jnp.all(jnp.isfinite(out)))
    # Tolerance accounts for bf16 parameter/activation rounding through 6
    # layers; with dtype=jnp.float32 packing the match is ~1e-6.
    assert bool(jnp.allclose(out, ref, rtol=5e-2, atol=5e-2)), (
        "max abs err = %g" % float(jnp.max(jnp.abs(out - ref))))
    print("KERNEL_OK")
</pallas_src>

<mosaic_0001>
module attributes {stable_mosaic.version = 11 : i64} {
  func.func @kernel(%arg0: i32, %arg1: memref<1xi32, #tpu.memory_space<smem>>, %arg2: memref<16x32xf32, #tpu.memory_space<vmem>>, %arg3: memref<120x128xbf16, #tpu.memory_space<vmem>>, %arg4: memref<1x120x128xbf16, #tpu.memory_space<vmem>>, %arg5: memref<16x16xf32, #tpu.memory_space<vmem>>) attributes {dimension_semantics = [#tpu.dimension_semantics<parallel>], iteration_bounds = array<i64: 2>, scalar_prefetch = 1 : i64, scratch_operands = 0 : i64, tpu.core_type = #tpu.core_type<tc>, window_params = [{transform_indices = @transform_0, window_bounds = array<i64: 16, 32>}, {pipeline_mode = #tpu.pipeline_mode<synchronous>, transform_indices = @transform_1, window_bounds = array<i64: 120, 128>}, {transform_indices = @transform_2, window_bounds = array<i64: 1, 120, 128>}, {transform_indices = @transform_3, window_bounds = array<i64: 16, 16>}]} {
    %c0 = arith.constant 0 : index
    %c0_0 = arith.constant 0 : index
    %0 = vector.load %arg2[%c0, %c0_0] : memref<16x32xf32, #tpu.memory_space<vmem>>, vector<16x32xf32>
    %1 = vector.extract_strided_slice %0 {offsets = [0, 0], sizes = [16, 16], strides = [1, 1]} : vector<16x32xf32> to vector<16x16xf32>
    %2 = vector.extract_strided_slice %0 {offsets = [0, 16], sizes = [16, 16], strides = [1, 1]} : vector<16x32xf32> to vector<16x16xf32>
    %c0_1 = arith.constant 0 : index
    %c0_2 = arith.constant 0 : index
    %3 = vector.load %arg3[%c0_1, %c0_2] : memref<120x128xbf16, #tpu.memory_space<vmem>>, vector<16x128xbf16>
    %c32 = arith.constant 32 : index
    %c0_3 = arith.constant 0 : index
    %4 = vector.load %arg3[%c32, %c0_3] : memref<120x128xbf16, #tpu.memory_space<vmem>>, vector<1x128xbf16>
    %5 = arith.truncf %1 : vector<16x16xf32> to vector<16x16xbf16>
    %cst = arith.constant dense<0.000000e+00> : vector<16x128xf32>
    %6 = tpu.matmul %5, %3, %cst {dimension_numbers = #tpu.dot_dimension_numbers<[1], [0], [0], [1], [0, 0, 1, 1], [], []>} : vector<16x16xbf16>, vector<16x128xbf16>, vector<16x128xf32> -> vector<16x128xf32>
    %7 = arith.extf %4 : vector<1x128xbf16> to vector<1x128xf32>
    %8 = vector.broadcast %7 : vector<1x128xf32> to vector<16x128xf32>
    %9 = arith.addf %6, %8 : vector<16x128xf32>
    %cst_4 = arith.constant 0.000000e+00 : f32
    %10 = vector.broadcast %cst_4 : f32 to vector<16x128xf32>
    %11 = arith.maximumf %9, %10 : vector<16x128xf32>
    %c40 = arith.constant 40 : index
    %c0_5 = arith.constant 0 : index
    %12 = vector.load %arg3[%c40, %c0_5] : memref<120x128xbf16, #tpu.memory_space<vmem>>, vector<32x128xbf16>
    %c72 = arith.constant 72 : index
    %c0_6 = arith.constant 0 : index
    %13 = vector.load %arg3[%c72, %c0_6] : memref<120x128xbf16, #tpu.memory_space<vmem>>, vector<1x128xbf16>
    %14 = vector.extract_strided_slice %11 {offsets = [0, 0], sizes = [16, 32], strides = [1, 1]} : vector<16x128xf32> to vector<16x32xf32>
    %15 = arith.truncf %14 : vector<16x32xf32> to vector<16x32xbf16>
    %cst_7 = arith.constant dense<0.000000e+00> : vector<16x128xf32>
    %16 = tpu.matmul %15, %12, %cst_7 {dimension_numbers = #tpu.dot_dimension_numbers<[1], [0], [0], [1], [0, 0, 1, 1], [], []>} : vector<16x32xbf16>, vector<32x128xbf16>, vector<16x128xf32> -> vector<16x128xf32>
    %17 = arith.extf %13 : vector<1x128xbf16> to vector<1x128xf32>
    %18 = vector.broadcast %17 : vector<1x128xf32> to vector<16x128xf32>
    %19 = arith.addf %16, %18 : vector<16x128xf32>
    %cst_8 = arith.constant 0.000000e+00 : f32
    %20 = vector.broadcast %cst_8 : f32 to vector<16x128xf32>
    %21 = arith.maximumf %19, %20 : vector<16x128xf32>
    %c80 = arith.constant 80 : index
    %c0_9 = arith.constant 0 : index
    %22 = vector.load %arg3[%c80, %c0_9] : memref<120x128xbf16, #tpu.memory_space<vmem>>, vector<32x128xbf16>
    %c112 = arith.constant 112 : index
    %c0_10 = arith.constant 0 : index
    %23 = vector.load %arg3[%c112, %c0_10] : memref<120x128xbf16, #tpu.memory_space<vmem>>, vector<1x128xbf16>
    %24 = vector.extract_strided_slice %21 {offsets = [0, 0], sizes = [16, 32], strides = [1, 1]} : vector<16x128xf32> to vector<16x32xf32>
    %25 = arith.truncf %24 : vector<16x32xf32> to vector<16x32xbf16>
    %cst_11 = arith.constant dense<0.000000e+00> : vector<16x128xf32>
    %26 = tpu.matmul %25, %22, %cst_11 {dimension_numbers = #tpu.dot_dimension_numbers<[1], [0], [0], [1], [0, 0, 1, 1], [], []>} : vector<16x32xbf16>, vector<32x128xbf16>, vector<16x128xf32> -> vector<16x128xf32>
    %27 = arith.extf %23 : vector<1x128xbf16> to vector<1x128xf32>
    %28 = vector.broadcast %27 : vector<1x128xf32> to vector<16x128xf32>
    %29 = arith.addf %26, %28 : vector<16x128xf32>
    %c0_i32 = arith.constant 0 : i32
    %c0_i32_12 = arith.constant 0 : i32
    %c0_i32_13 = arith.constant 0 : i32
    %30 = tpu.memref_slice %arg4[%c0_i32, %c0_i32_12, %c0_i32_13] : memref<1x120x128xbf16, #tpu.memory_space<vmem>> -> memref<1x120x128xbf16, #tpu.memory_space<vmem>>
    %31 = tpu.memref_squeeze %30 : memref<1x120x128xbf16, #tpu.memory_space<vmem>> -> memref<120x128xbf16, #tpu.memory_space<vmem>>
    %c0_14 = arith.constant 0 : index
    %c0_15 = arith.constant 0 : index
    %32 = vector.load %31[%c0_14, %c0_15] : memref<120x128xbf16, #tpu.memory_space<vmem>>, vector<32x128xbf16>
    %c0_i32_16 = arith.constant 0 : i32
    %c0_i32_17 = arith.constant 0 : i32
    %c0_i32_18 = arith.constant 0 : i32
    %33 = tpu.memref_slice %arg4[%c0_i32_16, %c0_i32_17, %c0_i32_18] : memref<1x120x128xbf16, #tpu.memory_space<vmem>> -> memref<1x120x128xbf16, #tpu.memory_space<vmem>>
    %34 = tpu.memref_squeeze %33 : memref<1x120x128xbf16, #tpu.memory_space<vmem>> -> memref<120x128xbf16, #tpu.memory_space<vmem>>
    %c32_19 = arith.constant 32 : index
    %c0_20 = arith.constant 0 : index
    %35 = vector.load %34[%c32_19, %c0_20] : memref<120x128xbf16, #tpu.memory_space<vmem>>, vector<1x128xbf16>
    %36 = vector.extract_strided_slice %29 {offsets = [0, 0], sizes = [16, 32], strides = [1, 1]} : vector<16x128xf32> to vector<16x32xf32>
    %37 = arith.truncf %36 : vector<16x32xf32> to vector<16x32xbf16>
    %cst_21 = arith.constant dense<0.000000e+00> : vector<16x128xf32>
    %38 = tpu.matmul %37, %32, %cst_21 {dimension_numbers = #tpu.dot_dimension_numbers<[1], [0], [0], [1], [0, 0, 1, 1], [], []>} : vector<16x32xbf16>, vector<32x128xbf16>, vector<16x128xf32> -> vector<16x128xf32>
    %39 = arith.extf %35 : vector<1x128xbf16> to vector<1x128xf32>
    %40 = vector.broadcast %39 : vector<1x128xf32> to vector<16x128xf32>
    %41 = arith.addf %38, %40 : vector<16x128xf32>
    %cst_22 = arith.constant 0.000000e+00 : f32
    %42 = vector.broadcast %cst_22 : f32 to vector<16x128xf32>
    %43 = arith.maximumf %41, %42 : vector<16x128xf32>
    %c0_i32_23 = arith.constant 0 : i32
    %c0_i32_24 = arith.constant 0 : i32
    %c0_i32_25 = arith.constant 0 : i32
    %44 = tpu.memref_slice %arg4[%c0_i32_23, %c0_i32_24, %c0_i32_25] : memref<1x120x128xbf16, #tpu.memory_space<vmem>> -> memref<1x120x128xbf16, #tpu.memory_space<vmem>>
    %45 = tpu.memref_squeeze %44 : memref<1x120x128xbf16, #tpu.memory_space<vmem>> -> memref<120x128xbf16, #tpu.memory_space<vmem>>
    %c40_26 = arith.constant 40 : index
    %c0_27 = arith.constant 0 : index
    %46 = vector.load %45[%c40_26, %c0_27] : memref<120x128xbf16, #tpu.memory_space<vmem>>, vector<32x128xbf16>
    %c0_i32_28 = arith.constant 0 : i32
    %c0_i32_29 = arith.constant 0 : i32
    %c0_i32_30 = arith.constant 0 : i32
    %47 = tpu.memref_slice %arg4[%c0_i32_28, %c0_i32_29, %c0_i32_30] : memref<1x120x128xbf16, #tpu.memory_space<vmem>> -> memref<1x120x128xbf16, #tpu.memory_space<vmem>>
    %48 = tpu.memref_squeeze %47 : memref<1x120x128xbf16, #tpu.memory_space<vmem>> -> memref<120x128xbf16, #tpu.memory_space<vmem>>
    %c72_31 = arith.constant 72 : index
    %c0_32 = arith.constant 0 : index
    %49 = vector.load %48[%c72_31, %c0_32] : memref<120x128xbf16, #tpu.memory_space<vmem>>, vector<1x128xbf16>
    %50 = vector.extract_strided_slice %43 {offsets = [0, 0], sizes = [16, 32], strides = [1, 1]} : vector<16x128xf32> to vector<16x32xf32>
    %51 = arith.truncf %50 : vector<16x32xf32> to vector<16x32xbf16>
    %cst_33 = arith.constant dense<0.000000e+00> : vector<16x128xf32>
    %52 = tpu.matmul %51, %46, %cst_33 {dimension_numbers = #tpu.dot_dimension_numbers<[1], [0], [0], [1], [0, 0, 1, 1], [], []>} : vector<16x32xbf16>, vector<32x128xbf16>, vector<16x128xf32> -> vector<16x128xf32>
    %53 = arith.extf %49 : vector<1x128xbf16> to vector<1x128xf32>
    %54 = vector.broadcast %53 : vector<1x128xf32> to vector<16x128xf32>
    %55 = arith.addf %52, %54 : vector<16x128xf32>
    %cst_34 = arith.constant 0.000000e+00 : f32
    %56 = vector.broadcast %cst_34 : f32 to vector<16x128xf32>
    %57 = arith.maximumf %55, %56 : vector<16x128xf32>
    %c0_i32_35 = arith.constant 0 : i32
    %c0_i32_36 = arith.constant 0 : i32
    %c0_i32_37 = arith.constant 0 : i32
    %58 = tpu.memref_slice %arg4[%c0_i32_35, %c0_i32_36, %c0_i32_37] : memref<1x120x128xbf16, #tpu.memory_space<vmem>> -> memref<1x120x128xbf16, #tpu.memory_space<vmem>>
    %59 = tpu.memref_squeeze %58 : memref<1x120x128xbf16, #tpu.memory_space<vmem>> -> memref<120x128xbf16, #tpu.memory_space<vmem>>
    %c80_38 = arith.constant 80 : index
    %c0_39 = arith.constant 0 : index
    %60 = vector.load %59[%c80_38, %c0_39] : memref<120x128xbf16, #tpu.memory_space<vmem>>, vector<32x128xbf16>
    %c0_i32_40 = arith.constant 0 : i32
    %c0_i32_41 = arith.constant 0 : i32
    %c0_i32_42 = arith.constant 0 : i32
    %61 = tpu.memref_slice %arg4[%c0_i32_40, %c0_i32_41, %c0_i32_42] : memref<1x120x128xbf16, #tpu.memory_space<vmem>> -> memref<1x120x128xbf16, #tpu.memory_space<vmem>>
    %62 = tpu.memref_squeeze %61 : memref<1x120x128xbf16, #tpu.memory_space<vmem>> -> memref<120x128xbf16, #tpu.memory_space<vmem>>
    %c112_43 = arith.constant 112 : index
    %c0_44 = arith.constant 0 : index
    %63 = vector.load %62[%c112_43, %c0_44] : memref<120x128xbf16, #tpu.memory_space<vmem>>, vector<1x128xbf16>
    %64 = vector.extract_strided_slice %57 {offsets = [0, 0], sizes = [16, 32], strides = [1, 1]} : vector<16x128xf32> to vector<16x32xf32>
    %65 = arith.truncf %64 : vector<16x32xf32> to vector<16x32xbf16>
    %cst_45 = arith.constant dense<0.000000e+00> : vector<16x128xf32>
    %66 = tpu.matmul %65, %60, %cst_45 {dimension_numbers = #tpu.dot_dimension_numbers<[1], [0], [0], [1], [0, 0, 1, 1], [], []>} : vector<16x32xbf16>, vector<32x128xbf16>, vector<16x128xf32> -> vector<16x128xf32>
    %67 = arith.extf %63 : vector<1x128xbf16> to vector<1x128xf32>
    %68 = vector.broadcast %67 : vector<1x128xf32> to vector<16x128xf32>
    %69 = arith.addf %66, %68 : vector<16x128xf32>
    %70 = vector.extract_strided_slice %69 {offsets = [0, 0], sizes = [16, 16], strides = [1, 1]} : vector<16x128xf32> to vector<16x16xf32>
    %71 = vector.extract_strided_slice %69 {offsets = [0, 16], sizes = [16, 16], strides = [1, 1]} : vector<16x128xf32> to vector<16x16xf32>
    %72 = math.exp %71 : vector<16x16xf32>
    %cst_46 = arith.constant 1.000000e-03 : f32
    %73 = vector.broadcast %cst_46 : f32 to vector<16x16xf32>
    %74 = arith.addf %72, %73 : vector<16x16xf32>
    %75 = arith.mulf %2, %74 : vector<16x16xf32>
    %76 = arith.addf %75, %70 : vector<16x16xf32>
    %c0_47 = arith.constant 0 : index
    %c0_48 = arith.constant 0 : index
    %77 = vector.load %arg5[%c0_47, %c0_48] : memref<16x16xf32, #tpu.memory_space<vmem>>, vector<16x16xf32>
    tpu.vector_store %arg5[%c0_47, %c0_48], %76 {strides = array<i32>} : memref<16x16xf32, #tpu.memory_space<vmem>>, vector<16x16xf32>,
    return
  }
  func.func @transform_0(%arg0: i32, %arg1: memref<1xi32, #tpu.memory_space<smem>>) -> (i32, i32) {
    %c0_i32 = arith.constant 0 : i32
    %c0_i32_0 = arith.constant 0 : i32
    return %arg0, %c0_i32 : i32, i32
  }
  func.func @transform_1(%arg0: i32, %arg1: memref<1xi32, #tpu.memory_space<smem>>) -> (i32, i32) {
    %c0_i32 = arith.constant 0 : i32
    %c0_i32_0 = arith.constant 0 : i32
    %c0_i32_1 = arith.constant 0 : i32
    return %c0_i32, %c0_i32_0 : i32, i32
  }
  func.func @transform_2(%arg0: i32, %arg1: memref<1xi32, #tpu.memory_space<smem>>) -> (i32, i32, i32) {
    %c0 = arith.constant 0 : index
    %0 = memref.load %arg1[%c0] : memref<1xi32, #tpu.memory_space<smem>>
    %c0_i32 = arith.constant 0 : i32
    %c0_i32_0 = arith.constant 0 : i32
    %c0_i32_1 = arith.constant 0 : i32
    return %0, %c0_i32, %c0_i32_0 : i32, i32, i32
  }
  func.func @transform_3(%arg0: i32, %arg1: memref<1xi32, #tpu.memory_space<smem>>) -> (i32, i32) {
    %c0_i32 = arith.constant 0 : i32
    %c0_i32_0 = arith.constant 0 : i32
    return %arg0, %c0_i32 : i32, i32
  }
}

</mosaic_0001>

<bundles_post_ra>
// kernel: ensemble_forward_pallas.1
= control target key start
LH: loop header
LB: loop body
LE: loop exit
PB: predicated region body
PF: predicated region fallthrough
CT: control target
= control target key end

     0   :  { %s1111_s0 = inlined_call_operand.<no memory space> [shape: s32[1], index: 0, kind: input, shape index: {}]   ;;  %s1112_s1 = inlined_call_operand.vmem [shape: f32[32,32], index: 1, kind: input, shape index: {}]   ;;  %s1113_s2 = inlined_call_operand.vmem [shape: bf16[120,128], index: 2, kind: input, shape index: {}]   ;;  %s1114_s3 = inlined_call_operand.hbm [shape: bf16[3,120,128], index: 3, kind: input, shape index: {}]   ;;  %s1115_s4 = inlined_call_operand.vmem [shape: f32[32,16], index: 4, kind: output, shape index: {}]  }
   0x1   :  { %9 = sst [smem:[#allocation3]] %s1111_s0 }
   0x2   :  { %10 = vsyncpa [#allocation5], 0  ;;  %s956_s17 = smov 0   ;;  %s958_s18 = smov 0  }
   0x3   :  { %s960_s19 = smov 0  }
   0x4 LB: > { %s708_s0 = sadd.s32 4294967295, %s919_s19   ;;  %s67_s20 = sld [smem:[#allocation3]]  ;;  %s919_s19 = sphi %s960_s19, %s16_s19   ;;  %s915_s18 = sphi %s958_s18, %s1107_s18   ;;  %s911_s17 = sphi %s956_s17, %s1124_s17  }
   0x5   : > { %p85_p0 = scmp.ne.s32.totalorder %s915_s18, %s911_s17  ;;  %p86_p1 = scmp.eq.s32.totalorder %s708_s0, 0 }
   0x6   : > { %p710_p2 = scmp.ge.s32.totalorder %s919_s19, 1  ;;  %p122_p3 = scmp.lt.s32.totalorder %s919_s19, 3 }
   0x7   : > { %p975_p4 = por %p86_p1, %p85_p0  ;;  %s921_s22 = smov [#allocation4]  }
   0x8   : > { %s141_s23 = sshll.u32 %s921_s22, 4  ;;  %p979_p5 = pnand %p710_p2, %p122_p3  ;;  %s983_s23 = int_to_ptr.vmem [resolvable:$true] %s141_s23 }
   0x9   : > { %s1119_s21 = scalar_select %p975_p4, 1, 0 }
   0xa   : > { %s1120_s24 = scalar_select %p979_p5, 1, 0 }
   0xb   : > { %s800_s25 = smul.u32 960, %s67_s20  ;;  %p803_p6 = pneg %p979_p5 }
   0xc   : > { %s866_s7 = scalar_lea.hbm %s1114_s3, 2880 }
   0xd   : > { %s140_s28 = scalar_lea.hbm %s1114_s3, %s800_s25  ;;  %p992_p7 = pnand %p803_p6, %p975_p4 }
   0xe   : > { %s861_s30 = scalar_lea.hbm %s140_s28, 960  ;;  %p867_p12 = scmp.lt.s32.totalorder %s140_s28, %s1114_s3 }
   0xf   : > { %p862_p8 = scmp.ne.s32.totalorder %s140_s28, %s861_s30  ;;  %p863_p9 = pneg %p992_p7 }
  0x10   : > { %p868_p13 = scmp.lt.s32.totalorder %s866_s7, %s861_s30 }
  0x11   : > { %p864_p10 = pnand %p863_p9, %p862_p8 }
  0x12   : > { %p869_p0 = por %p868_p13, %p867_p12 }
  0x13   : > { %p865_p11 = pneg %p864_p10 }
  0x15   : > { %p870_p1 = pnand %p869_p0, %p865_p11 }
  0x17   : > { %873 = shalt.err (!%p870_p1)
}
  0x18   : > { %s874_s10 = scalar_lea.vmem %s983_s23, 960  ;;  %p882_p8 = scmp.lt.s32.totalorder %s983_s23, %s983_s23 }
  0x19   : > { %p875_p2 = scmp.ne.s32.totalorder %s983_s23, %s874_s10  ;;  %p883_p10 = scmp.lt.s32.totalorder %s874_s10, %s874_s10 }
  0x1b   : > { %p877_p3 = pnand %p875_p2, %p863_p9  ;;  %p884_p4 = por %p883_p10, %p882_p8 }
  0x1d   : > { %p878_p6 = pneg %p877_p3 }
  0x1f   : > { %p885_p5 = pnand %p884_p4, %p878_p6 }
  0x21   : > { %888 = shalt.err (!%p885_p5)
}
  0x22   : > { %s922_s11 = smov 64   ;;  %s923_s12 = smov 4  }
  0x23   : > { %806 = dma.hbm_to_vmem [thread:$0]  (!%p992_p7), %s140_s28, 960, %s983_s23, [#allocation5], %s922_s11, %s922_s11, %s923_s12  }
  0x24   : > { %p1122_p11 = scmp.ne.s32.totalorder %s1120_s24, 0 }
  0x25   : > { %p1123_p12 = scmp.ne.s32.totalorder (!%p1122_p11), %s1119_s21, 0 }
  0x26   : > { %166 = sbr.rel (%p1122_p11) target bundleno = 1498 (0x5da), region = 32 }
  0x2b   : > { %906 = dma.done.wait (%p1123_p12), [#allocation5], 960  }
  0x2c   : > { %908 = vsyncadd (%p1123_p12), [#allocation5], 4294966336  ;;  %s714_s13 = sshll.u32 %s708_s0, 1  ;;  %v924_v0 = vmov 0.0   ;;  %vm925_vm0 = vmmov 0   ;;  %v846_v1 = vld [vmem:[%s1113_s2] sm:$0xff]   ;;  %v211_v7 = vlaneseq }
  0x2d   : > { %754 = vmatprep.subr.bf16.mxu0 %v924_v0  ;;  %756 = vmatprep.mubr.msk.bf16.mxu0 %vm925_vm0, %v924_v0  ;;  %p191_p4 = scmp.lt.s32.totalorder %s714_s13, 3  ;;  %vm221_vm1 = vcmask 130048   ;;  %v847_v5 = vld [vmem:[%s1113_s2 + $0x1c] sm:$0xff]   ;;  %v848_v6 = vld [vmem:[%s1113_s2 + $0x14] sm:$0xff]   ;;  %v208_v9 = vld [vmem:[%s1113_s2 + $0x10] sm:$0x1] }
  0x2e   : > { %760 = vmatprep.subr.bf16.mxu1 %v924_v0  ;;  %764 = vmatprep.mubr.msk.bf16.mxu1 %vm925_vm0, %v924_v0  ;;  %v212_v8 = vshrl.u32 %v211_v7, 7  ;;  %v210_v10 = vunpack.c.l.bf16 %v208_v9  ;;  %vm291_vm2 = vcmask 261120   ;;  %v849_v22 = vld [vmem:[%s1113_s2 + $0x30] sm:$0xff]   ;;  %v850_v23 = vld [vmem:[%s1113_s2 + $0x28] sm:$0xff]   ;;  %v272_v24 = vld [vmem:[%s1113_s2 + $0x24] sm:$0x1] }
  0x2f   : > { %s1126_s13 = smov (!%p191_p4, %s714_s13), 3  ;;  %755 = vmatpush3.bf16.msra.mxu0 %v846_v1  ;;  %761 = vmatpush3.bf16.msra.mxu1 %v847_v5  ;;  %v274_v25 = vunpack.c.l.bf16 %v272_v24  ;;  %v851_v36 = vld [vmem:[#allocation4 + $0x8] sm:$0xff]   ;;  %v852_v37 = vld [vmem:[#allocation4] sm:$0xff]   ;;  %v342_v38 = vld [vmem:[%s1113_s2 + $0x38] sm:$0x1]  ;;  %s926_s9 = smov 16  }
  0x30   : > { %s715_s14 = sshll.u32 %s1126_s13, 3  ;;  %768 = vmatprep.subr.bf16.mxu0 %v924_v0  ;;  %762 = vmatprep.subr.bf16.mxu1 %v924_v0  ;;  %v1057_v11 = vsub.s32 0, %v212_v8  ;;  %v344_v39 = vunpack.c.l.bf16 %v342_v38  ;;  %v853_v48 = vld [vmem:[#allocation4 + $0x1c] sm:$0xff]   ;;  %v854_v49 = vld [vmem:[#allocation4 + $0x14] sm:$0xff]   ;;  %v409_v50 = vld [vmem:[#allocation4 + $0x10] sm:$0x1] }
  0x31   : > { %s194_s17 = scalar_lea.vmem %s1112_s1, %s715_s14  ;;  %v411_v51 = vunpack.c.l.bf16 %v409_v50  ;;  %v855_v62 = vld [vmem:[#allocation4 + $0x30] sm:$0xff]   ;;  %v856_v63 = vld [vmem:[#allocation4 + $0x28] sm:$0xff]   ;;  %v478_v1 = vld [vmem:[#allocation4 + $0x24] sm:$0x1]  ;;  %s927_s10 = smov 112  }
  0x32   : > { %v1036_v2 = vld [vmem:[%s194_s17] sm:$0xff]  ;;  %v1038_v3 = vld [vmem:[%s194_s17 + $0x8] sm:$0xff]  ;;  %v214_v12 = vrot.slane %v210_v10, %v1057_v11  ;;  %v278_v26 = vrot.slane %v274_v25, %v1057_v11  ;;  %v348_v41 = vrot.slane %v344_v39, %v1057_v11  ;;  %s201_s15 = scalar_lea.vmem %s1115_s4, %s715_s14 }
  0x33   : > { %v209_v4 = vpack.c.bf16 %v1038_v3, %v1036_v2  ;;  %763 = vmatpush3.bf16.msra.mxu1 %v848_v6  ;;  %v415_v52 = vrot.slane %v411_v51, %v1057_v11 }
  0x34   : > { %776 = vmatprep.subr.bf16.mxu1 %v924_v0 }
  0x35   : > { %757 = vmatmul.mubr.msk.bf16.vlgmr.msra.gmra.mxu0 %vm221_vm1, %v209_v4  ;;  %v480_v4 = vunpack.c.l.bf16 %v478_v1 }
  0x36   : > { %772 = vmatprep.mubr.msk.bf16.mxu0 %vm925_vm0, %v924_v0  ;;  %769 = vmatpush3.bf16.msra.mxu0 %v849_v22 }
  0x37   : > { %770 = vmatprep.subr.bf16.mxu0 %v924_v0  ;;  %v484_v5 = vrot.slane %v480_v4, %v1057_v11 }
  0x3a   : > { %771 = vmatpush3.bf16.msra.mxu0 %v850_v23 }
  0x3b   : > { %784 = vmatprep.subr.bf16.mxu0 %v924_v0 }
  0xf5   : > { %v259_v13 = vpop.f32.mrf.mxu0 }
  0xf6   : > { %v260_v15 = vadd.f32 %v259_v13, %v214_v12 }
  0xf7   : > { %v758_v14 = vpop.f32.mrf.mxu0 }
  0xf8   : > { %v266_v19 = vmax.f32 %v260_v15, 0.0 }
  0xf9   : > { %v262_v16 = vpop.f32.mrf.mxu0 }
  0xfa   : > { %v263_v17 = vadd.f32 %v262_v16, %v214_v12  ;;  %v547_v16 = vld [vmem:[#allocation4 + $0x38] sm:$0x1] }
  0xfb   : > { %v759_v18 = vpop.f32.mrf.mxu0 }
  0xfc   : > { %v267_v20 = vmax.f32 %v263_v17, 0.0  ;;  %v549_v17 = vunpack.c.l.bf16 %v547_v16 }
  0xfe   : > { %v273_v21 = vpack.c.bf16 %v267_v20, %v266_v19 }
 0x100   : > { %765 = vmatmul.mubr.msk.bf16.vlgmr.msra.gmra.mxu1 %vm291_vm2, %v273_v21 }
 0x101   : > { %780 = vmatprep.mubr.msk.bf16.mxu1 %vm925_vm0, %v924_v0  ;;  %777 = vmatpush3.bf16.msra.mxu1 %v851_v36 }
 0x102   : > { %778 = vmatprep.subr.bf16.mxu1 %v924_v0 }
 0x105   : > { %779 = vmatpush3.bf16.msra.mxu1 %v852_v37 }
 0x106   : > { %792 = vmatprep.subr.bf16.mxu1 %v924_v0 }
 0x1c0   : > { %v329_v27 = vpop.f32.mrf.mxu1 }
 0x1c1   : > { %v330_v29 = vadd.f32 %v329_v27, %v278_v26 }
 0x1c2   : > { %v766_v28 = vpop.f32.mrf.mxu1 }
 0x1c3   : > { %v336_v33 = vmax.f32 %v330_v29, 0.0 }
 0x1c4   : > { %v332_v30 = vpop.f32.mrf.mxu1 }
 0x1c5   : > { %v333_v31 = vadd.f32 %v332_v30, %v278_v26 }
 0x1c6   : > { %v767_v32 = vpop.f32.mrf.mxu1 }
 0x1c7   : > { %v337_v34 = vmax.f32 %v333_v31, 0.0 }
 0x1c9   : > { %v343_v35 = vpack.c.bf16 %v337_v34, %v336_v33 }
 0x1cb   : > { %773 = vmatmul.mubr.msk.bf16.vlgmr.msra.gmra.mxu0 %vm291_vm2, %v343_v35 }
 0x1cc   : > { %788 = vmatprep.mubr.msk.bf16.mxu0 %vm925_vm0, %v924_v0  ;;  %785 = vmatpush3.bf16.msra.mxu0 %v853_v48 }
 0x1cd   : > { %786 = vmatprep.subr.bf16.mxu0 %v924_v0 }
 0x1d0   : > { %787 = vmatpush3.bf16.msra.mxu0 %v854_v49 }
 0x28b   : > { %v398_v40 = vpop.f32.mrf.mxu0 }
 0x28c   : > { %v399_v44 = vadd.f32 %v398_v40, %v348_v41 }
 0x28d   : > { %v774_v42 = vpop.f32.mrf.mxu0 }
 0x28f   : > { %v401_v43 = vpop.f32.mrf.mxu0 }
 0x290   : > { %v402_v45 = vadd.f32 %v401_v43, %v348_v41 }
 0x291   : > { %v775_v46 = vpop.f32.mrf.mxu0 }
 0x292   : > { %v410_v47 = vpack.c.bf16 %v402_v45, %v399_v44 }
 0x294   : > { %781 = vmatmul.mubr.msk.bf16.vlgmr.msra.gmra.mxu1 %vm291_vm2, %v410_v47 }
 0x295   : > { %796 = vmatprep.mubr.msk.bf16.mxu1 %vm925_vm0, %v924_v0  ;;  %793 = vmatpush3.bf16.msra.mxu1 %v855_v62 }
 0x296   : > { %794 = vmatprep.subr.bf16.mxu1 %v924_v0  ;;  %v553_v0 = vrot.slane %v549_v17, %v1057_v11 }
 0x299   : > { %795 = vmatpush3.bf16.msra.mxu1 %v856_v63 }
 0x354   : > { %v465_v53 = vpop.f32.mrf.mxu1 }
 0x355   : > { %v466_v55 = vadd.f32 %v465_v53, %v415_v52 }
 0x356   : > { %v782_v54 = vpop.f32.mrf.mxu1 }
 0x357   : > { %v472_v59 = vmax.f32 %v466_v55, 0.0 }
 0x358   : > { %v468_v56 = vpop.f32.mrf.mxu1 }
 0x359   : > { %v469_v57 = vadd.f32 %v468_v56, %v415_v52 }
 0x35a   : > { %v783_v58 = vpop.f32.mrf.mxu1 }
 0x35b   : > { %v473_v60 = vmax.f32 %v469_v57, 0.0 }
 0x35d   : > { %v479_v61 = vpack.c.bf16 %v473_v60, %v472_v59 }
 0x35f   : > { %789 = vmatmul.mubr.msk.bf16.vlgmr.msra.gmra.mxu0 %vm291_vm2, %v479_v61 }
 0x41f   : > { %v534_v6 = vpop.f32.mrf.mxu0 }
 0x420   : > { %v535_v8 = vadd.f32 %v534_v6, %v484_v5 }
 0x421   : > { %v790_v7 = vpop.f32.mrf.mxu0 }
 0x422   : > { %v541_v13 = vmax.f32 %v535_v8, 0.0 }
 0x423   : > { %v537_v9 = vpop.f32.mrf.mxu0 }
 0x424   : > { %v538_v10 = vadd.f32 %v537_v9, %v484_v5 }
 0x425   : > { %v791_v12 = vpop.f32.mrf.mxu0 }
 0x426   : > { %v542_v14 = vmax.f32 %v538_v10, 0.0 }
 0x428   : > { %v548_v15 = vpack.c.bf16 %v542_v14, %v541_v13 }
 0x42a   : > { %797 = vmatmul.mubr.msk.bf16.vlgmr.msra.gmra.mxu1 %vm291_vm2, %v548_v15 }
 0x4ea   : > { %v603_v18 = vpop.f32.mrf.mxu1 }
 0x4eb   : > { %v604_v19 = vadd.f32 %v603_v18, %v553_v0 }
 0x4ec   : > { %v798_v20 = vpop.f32.mrf.mxu1 }
 0x4ed   : > { %620 = vrot.lane.b32.xlu0 %v604_v19, %s926_s9  ;;  %v610_v24 = vmul.f32 1.442695, %v604_v19 }
 0x4ee   : > { %v606_v21 = vpop.f32.mrf.mxu1 }
 0x4ef   : > { %v607_v22 = vadd.f32 %v606_v21, %v553_v0  ;;  %857 = vpow2.f32 %v610_v24 }
 0x4f0   : > { %v799_v23 = vpop.f32.mrf.mxu1 }
 0x4f1   : > { %622 = vrot.lane.b32.xlu0 %v607_v22, %s926_s9  ;;  %v612_v25 = vmul.f32 1.442695, %v607_v22 }
 0x4f3   : > { %859 = vpow2.f32 %v612_v25 }
 0x4fc   : > { %v858_v26 = vpop.eup %857 }
 0x4fd   : > { %v614_v27 = vadd.f32 0.001, %v858_v26 }
 0x4ff   : > { %v616_v29 = vmul.f32 %v614_v27, %v1036_v2 }
 0x500   : > { %v860_v28 = vpop.eup %859 }
 0x501   : > { %v615_v11 = vadd.f32 0.001, %v860_v28 }
 0x503   : > { %v617_v32 = vmul.f32 %v615_v11, %v1038_v3 }
 0x55f   : > { %v621_v30 = vpop.permute.xlu0 %620 }
 0x560   : > { %v626_v31 = vadd.f32 %v621_v30, %v616_v29 }
 0x562   : > { %630 = vrot.lane.b32.xlu1 %v626_v31, %s927_s10 }
 0x563   : > { %v623_v33 = vpop.permute.xlu0 %622 }
 0x564   : > { %v627_v34 = vadd.f32 %v623_v33, %v617_v32 }
 0x566   : > { %632 = vrot.lane.b32.xlu1 %v627_v34, %s927_s10 }
 0x5d4   : > { %v631_v35 = vpop.permute.xlu1 %630 }
 0x5d5   : > { %636 = vst.msk [vmem:[%s201_s15] sm:$0xff] %vm221_vm1, %v631_v35 }
 0x5d8   : > { %v633_v36 = vpop.permute.xlu1 %632 }
 0x5d9   : > { %637 = vst.msk [vmem:[%s201_s15 + $0x8] sm:$0xff] %vm221_vm1, %v633_v36 }
 0x5da PF: > { %s16_s19 = sadd.s32 1, %s919_s19   ;;  %s1124_s17 = smov %s915_s18 }
 0x5db   : > { %p13_p5 = scmp.ge.s32.totalorder %s16_s19, 4   ;;  %s1107_s18 = smov 0  }
 0x5dd   :  { %15 = sbr.rel (!%p13_p5) target bundleno = 4 (0x4), region = 68 }
 0x5e2   :  { %660 = vsyncpa [#allocation5], 1 }
 0x5e3   :  { %662 = vsyncpa [#allocation5 + $0x1], 1 }

</bundles_post_ra>
